<compile_context>
chip_gen: v7x
topology: tpu7x:2x2x1
jax: 0.10.0
libtpu: 0.0.40
codegen_flags: <defaults>
</compile_context>

<pallas_src>
import functools

import jax
import jax.numpy as jnp
from jax.experimental import pallas as pl
from jax.experimental.pallas import tpu as pltpu


# --------------------------------------------------------------------------- #
# Kernel: per-row NLL (cross entropy without the mean).
# --------------------------------------------------------------------------- #
def _nll_kernel(logits_ref, target_ref, nll_ref, *, batch, bf16_elementwise):
    i = pl.program_id(0)

    x = logits_ref[...]                                        # (TB, C) native dtype
    if not bf16_elementwise:
        # Safe / default path: all elementwise math in f32 (required on v5e,
        # matches the f32 reference everywhere).
        x = x.astype(jnp.float32)
    tb, c = x.shape
    tgt = target_ref[...]                                      # (TB, 1) int32

    row_max = jnp.max(x, axis=-1, keepdims=True)               # (TB, 1)
    shifted = x - row_max                                      # native dtype VPU sub
    # exp in the native dtype (bf16 EUP on v6e/v7x when bf16_elementwise=True);
    # lane reductions always accumulate in f32.
    sum_exp = jnp.sum(jnp.exp(shifted), axis=-1, keepdims=True,
                      dtype=jnp.float32)                        # (TB, 1) f32
    lse = jnp.log(sum_exp)                                      # (TB, 1) f32

    cls = jax.lax.broadcasted_iota(jnp.int32, (tb, c), 1)
    picked = jnp.sum(jnp.where(cls == tgt, shifted, jnp.zeros_like(shifted)),
                     axis=-1, keepdims=True, dtype=jnp.float32)  # (TB, 1) f32

    nll = lse - picked                                           # (TB, 1) f32

    # Zero out padded rows of a partial last tile (garbage VMEM can be Inf/NaN).
    row_ids = i * tb + jax.lax.broadcasted_iota(jnp.int32, (tb, 1), 0)
    nll_ref[...] = jnp.where(row_ids < batch, nll, 0.0)


# --------------------------------------------------------------------------- #
# Tile selection: biggest batch tile that fits a VMEM budget (double-buffered),
# capped at 1024 rows, multiple of 8 sublanes.
# --------------------------------------------------------------------------- #
def _round_up(x, m):
    return ((x + m - 1) // m) * m


def _pick_block_b(b, c, itemsize, *, vmem_budget_bytes=20 << 20, max_tb=1024):
    # Dominant VMEM consumer: 2 (double-buffer) x tb x C x itemsize for the logits.
    rows_by_budget = max(8, vmem_budget_bytes // (2 * max(c, 1) * itemsize))
    tb = min(max_tb, rows_by_budget)
    tb = max(8, (tb // 8) * 8)
    tb = min(tb, _round_up(b, 8))
    return tb


def _per_row_nll(logits, target2d, *, bf16_elementwise=False):
    b, c = logits.shape
    tb = _pick_block_b(b, c, jnp.dtype(logits.dtype).itemsize)
    grid = (pl.cdiv(b, tb),)

    kernel = functools.partial(
        _nll_kernel, batch=b, bf16_elementwise=bool(bf16_elementwise))

    return pl.pallas_call(
        kernel,
        out_shape=jax.ShapeDtypeStruct((b, 1), jnp.float32),
        grid_spec=pltpu.PrefetchScalarGridSpec(
            num_scalar_prefetch=0,
            grid=grid,
            in_specs=[
                pl.BlockSpec((tb, c), lambda i: (i, 0)),   # logits tile (native dtype)
                pl.BlockSpec((tb, 1), lambda i: (i, 0)),   # target tile (int32)
            ],
            out_specs=pl.BlockSpec((tb, 1), lambda i: (i, 0)),
        ),
        compiler_params=pltpu.CompilerParams(
            dimension_semantics=("parallel",)),             # megacore-shardable (v7x)
    )(logits, target2d)


# --------------------------------------------------------------------------- #
# Forward: mirrors search_loss.forward.  `teacher_output` is unused (as in the
# PyTorch module).  The trivial scalar combine is plain jnp in the wrapper
# (per perf review), the heavy per-row softmax/NLL work is the Pallas kernel.
# --------------------------------------------------------------------------- #
def search_loss_forward(output, teacher_output, cost, target, rkd_loss=None,
                        *, alpha, beta, gamma, bf16_elementwise=False):
    del teacher_output
    b = output.shape[0]
    target2d = jnp.asarray(target, jnp.int32).reshape(-1, 1)

    nll = _per_row_nll(output, target2d, bf16_elementwise=bf16_elementwise)
    ce = jnp.sum(nll) * jnp.float32(1.0 / b)                       # mean over global B

    # latency_loss = log(max(cost) ** beta) == beta * log(max(cost)); assumes cost > 0.
    latency_loss = jnp.float32(beta) * jnp.log(jnp.max(jnp.asarray(cost, jnp.float32)))

    kl = 0.0  # TODO(synk): kl is the constant 0.0 in the original module.
    if rkd_loss is not None:
        rkd = jnp.asarray(rkd_loss, jnp.float32)
        network_loss = ce + jnp.float32(gamma) * rkd + kl
        loss = jnp.float32(alpha) * network_loss * latency_loss
        return loss, ce, rkd, kl, latency_loss
    else:
        network_loss = ce
        loss = jnp.float32(alpha) * network_loss * latency_loss
        return loss, network_loss, latency_loss


# --------------------------------------------------------------------------- #
# Pure-JAX reference.
# --------------------------------------------------------------------------- #
def _reference(output, cost, target, rkd_loss, alpha, beta, gamma):
    logp = jax.nn.log_softmax(output.astype(jnp.float32), axis=-1)
    ce = -jnp.mean(jnp.take_along_axis(logp, jnp.asarray(target)[:, None], axis=-1))
    lat = jnp.log(jnp.max(cost.astype(jnp.float32)) ** beta)
    net = ce + (gamma * jnp.float32(rkd_loss) if rkd_loss is not None else 0.0)
    return alpha * net * lat, ce, lat


if __name__ == "__main__":
    key = jax.random.PRNGKey(0)
    k1, k2, k3, k4 = jax.random.split(key, 4)

    alpha, beta, gamma = 0.5, 0.6, 1.5

    # --- small f32 case, rkd branch ------------------------------------------
    B, C, K = 8, 32, 16
    output = jax.random.normal(k1, (B, C), dtype=jnp.float32)
    teacher_output = jax.random.normal(k2, (B, C), dtype=jnp.float32)  # unused by forward
    target = jax.random.randint(k3, (B,), 0, C)
    cost = jax.random.uniform(k4, (1, K), dtype=jnp.float32, minval=0.5, maxval=2.0)
    rkd_loss = jnp.float32(0.37)

    loss, ce, rkd, kl, lat = search_loss_forward(
        output, teacher_output, cost, target, rkd_loss,
        alpha=alpha, beta=beta, gamma=gamma)
    jax.block_until_ready((loss, ce, rkd, lat))
    ref_loss, ref_ce, ref_lat = _reference(output, cost, target, rkd_loss, alpha, beta, gamma)
    assert jnp.allclose(loss, ref_loss, atol=1e-4, rtol=1e-4)
    assert jnp.allclose(ce, ref_ce, atol=1e-4, rtol=1e-4)
    assert jnp.allclose(lat, ref_lat, atol=1e-4, rtol=1e-4)

    # --- small f32 case, no-rkd branch ---------------------------------------
    loss2, net2, lat2 = search_loss_forward(
        output, teacher_output, cost, target, None,
        alpha=alpha, beta=beta, gamma=gamma)
    jax.block_until_ready((loss2, net2, lat2))
    ref_loss2, ref_ce2, _ = _reference(output, cost, target, None, alpha, beta, gamma)
    assert jnp.allclose(loss2, ref_loss2, atol=1e-4, rtol=1e-4)
    assert jnp.allclose(net2, ref_ce2, atol=1e-4, rtol=1e-4)

    # --- bf16 logits, non-multiple batch (partial tile + in-kernel f32 cast) --
    B2 = 300
    out_b = jax.random.normal(k1, (B2, C), dtype=jnp.bfloat16)
    tgt_b = jax.random.randint(k2, (B2,), 0, C)
    loss3, net3, lat3 = search_loss_forward(
        out_b, teacher_output, cost, tgt_b, None,
        alpha=alpha, beta=beta, gamma=gamma)
    jax.block_until_ready((loss3, net3, lat3))
    ref_loss3, ref_ce3, ref_lat3 = _reference(out_b, cost, tgt_b, None, alpha, beta, gamma)
    assert jnp.allclose(loss3, ref_loss3, atol=1e-3, rtol=1e-3)
    assert jnp.allclose(net3, ref_ce3, atol=1e-3, rtol=1e-3)
    assert jnp.allclose(lat3, ref_lat3, atol=1e-4, rtol=1e-4)

    # --- larger bf16 batch: exercises multi-tile "parallel" grid + masked tail -
    B3, C3 = 2500, 64
    out_c = jax.random.normal(k3, (B3, C3), dtype=jnp.bfloat16)
    tgt_c = jax.random.randint(k4, (B3,), 0, C3)
    loss4, net4, lat4 = search_loss_forward(
        out_c, teacher_output, cost, tgt_c, None,
        alpha=alpha, beta=beta, gamma=gamma)
    jax.block_until_ready((loss4, net4, lat4))
    ref_loss4, ref_ce4, _ = _reference(out_c, cost, tgt_c, None, alpha, beta, gamma)
    assert jnp.allclose(loss4, ref_loss4, atol=1e-3, rtol=1e-3)
    assert jnp.allclose(net4, ref_ce4, atol=1e-3, rtol=1e-3)

    # --- optional bf16-elementwise path (v6e/v7x VPU/EUP relief), loose tol ---
    loss5, net5, lat5 = search_loss_forward(
        out_c, teacher_output, cost, tgt_c, None,
        alpha=alpha, beta=beta, gamma=gamma, bf16_elementwise=True)
    jax.block_until_ready((loss5, net5, lat5))
    assert jnp.allclose(loss5, ref_loss4, atol=3e-2, rtol=3e-2)
    assert jnp.allclose(net5, ref_ce4, atol=3e-2, rtol=3e-2)

    print("KERNEL_OK")
</pallas_src>

<mosaic_0001>
module attributes {stable_mosaic.version = 11 : i64} {
  func.func @_nll_kernel(%arg0: i32, %arg1: memref<8x32xf32, #tpu.memory_space<vmem>>, %arg2: memref<8x1xi32, #tpu.memory_space<vmem>>, %arg3: memref<8x1xf32, #tpu.memory_space<vmem>>) attributes {dimension_semantics = [#tpu.dimension_semantics<parallel>], iteration_bounds = array<i64: 1>, scalar_prefetch = 0 : i64, scratch_operands = 0 : i64, tpu.core_type = #tpu.core_type<tc>, window_params = [{transform_indices = @transform_0, window_bounds = array<i64: 8, 32>}, {transform_indices = @transform_1, window_bounds = array<i64: 8, 1>}, {transform_indices = @transform_2, window_bounds = array<i64: 8, 1>}]} {
    %c0 = arith.constant 0 : index
    %c0_0 = arith.constant 0 : index
    %0 = vector.load %arg1[%c0, %c0_0] : memref<8x32xf32, #tpu.memory_space<vmem>>, vector<8x32xf32>
    %c0_1 = arith.constant 0 : index
    %c0_2 = arith.constant 0 : index
    %1 = vector.load %arg2[%c0_1, %c0_2] : memref<8x1xi32, #tpu.memory_space<vmem>>, vector<8x1xi32>
    %cst = arith.constant dense<0xFF800000> : vector<8xf32>
    %2 = vector.multi_reduction <maximumf>, %0, %cst [1] : vector<8x32xf32> to vector<8xf32>
    %3 = vector.shape_cast %2 : vector<8xf32> to vector<8x1xf32>
    %4 = vector.broadcast %3 : vector<8x1xf32> to vector<8x32xf32>
    %5 = arith.subf %0, %4 : vector<8x32xf32>
    %6 = math.exp %5 : vector<8x32xf32>
    %cst_3 = arith.constant dense<0.000000e+00> : vector<8xf32>
    %7 = vector.multi_reduction <add>, %6, %cst_3 [1] : vector<8x32xf32> to vector<8xf32>
    %8 = vector.shape_cast %7 : vector<8xf32> to vector<8x1xf32>
    %9 = math.log %8 : vector<8x1xf32>
    %10 = tpu.iota {dimensions = array<i32: 1>} : vector<8x32xi32>
    %11 = vector.broadcast %1 : vector<8x1xi32> to vector<8x32xi32>
    %12 = arith.cmpi eq, %10, %11 : vector<8x32xi32>
    %cst_4 = arith.constant 0.000000e+00 : f32
    %13 = vector.broadcast %cst_4 : f32 to vector<8x32xf32>
    %14 = arith.select %12, %5, %13 : vector<8x32xi1>, vector<8x32xf32>
    %cst_5 = arith.constant dense<0.000000e+00> : vector<8xf32>
    %15 = vector.multi_reduction <add>, %14, %cst_5 [1] : vector<8x32xf32> to vector<8xf32>
    %16 = vector.shape_cast %15 : vector<8xf32> to vector<8x1xf32>
    %17 = arith.subf %9, %16 : vector<8x1xf32>
    %c8_i32 = arith.constant 8 : i32
    %18 = arith.muli %arg0, %c8_i32 : i32
    %19 = tpu.iota {dimensions = array<i32: 0>} : vector<8x1xi32>
    %20 = vector.broadcast %18 : i32 to vector<8x1xi32>
    %21 = arith.addi %20, %19 : vector<8x1xi32>
    %c8_i32_6 = arith.constant 8 : i32
    %22 = vector.broadcast %c8_i32_6 : i32 to vector<8x1xi32>
    %23 = arith.cmpi slt, %21, %22 : vector<8x1xi32>
    %cst_7 = arith.constant 0.000000e+00 : f32
    %24 = vector.broadcast %cst_7 : f32 to vector<8x1xf32>
    %25 = arith.select %23, %17, %24 : vector<8x1xi1>, vector<8x1xf32>
    %c0_8 = arith.constant 0 : index
    %c0_9 = arith.constant 0 : index
    %26 = vector.load %arg3[%c0_8, %c0_9] : memref<8x1xf32, #tpu.memory_space<vmem>>, vector<8x1xf32>
    tpu.vector_store %arg3[%c0_8, %c0_9], %25 {strides = array<i32>} : memref<8x1xf32, #tpu.memory_space<vmem>>, vector<8x1xf32>,
    return
  }
  func.func @transform_0(%arg0: i32) -> (i32, i32) {
    %c0_i32 = arith.constant 0 : i32
    %c0_i32_0 = arith.constant 0 : i32
    return %arg0, %c0_i32 : i32, i32
  }
  func.func @transform_1(%arg0: i32) -> (i32, i32) {
    %c0_i32 = arith.constant 0 : i32
    %c0_i32_0 = arith.constant 0 : i32
    return %arg0, %c0_i32 : i32, i32
  }
  func.func @transform_2(%arg0: i32) -> (i32, i32) {
    %c0_i32 = arith.constant 0 : i32
    %c0_i32_0 = arith.constant 0 : i32
    return %arg0, %c0_i32 : i32, i32
  }
}

</mosaic_0001>

<bundles_post_ra>
// kernel: tpu_custom_call.1
= control target key start
LH: loop header
LB: loop body
LE: loop exit
PB: predicated region body
PF: predicated region fallthrough
CT: control target
= control target key end

     0   :  { %vm13_vm0 = vcmask 261120   ;;  %v55_v1 = vmov 0   ;;  %v25_v7 = vlaneseq  ;;  %vm43_vm2 = vcmask 7168   ;;  %s83_s0 = inlined_call_operand.vmem [shape: f32[8,32], index: 0, kind: input, shape index: {}]   ;;  %s84_s1 = inlined_call_operand.vmem [shape: s32[8,1], index: 1, kind: input, shape index: {}]   ;;  %s85_s2 = inlined_call_operand.vmem [shape: f32[8,1], index: 2, kind: output, shape index: {}]  }
   0x1   :  { %v11_v0 = vld [vmem:[%s83_s0] sm:$0xff]  ;;  %50 = vset.pattern.permute.xlu0 %v55_v1 }
   0x2   :  { %v14_v2 = vsel %vm13_vm0, %v11_v0, -inf  ;;  %v12_v3 = vld [vmem:[%s84_s1] sm:$0xff]  ;;  %v26_v8 = vand.u32 127, %v25_v7 }
   0x3   :  { %15 = vmax.xlane.f32.xlu0 %v14_v2 }
  0x19   :  { %28 = vperm.xlu0 %50, %v12_v3  }
  0x90   :  { %v16_v4 = vpop.xlane.xlu0 %15 }
  0x91   :  { %v17_v5 = vsub.f32 %v11_v0, %v16_v4 }
  0x93   :  { %v18_v6 = vmul.f32 1.442695, %v17_v5 }
  0x95   :  { %51 = vpow2.f32 %v18_v6 }
  0x98   :  { %v29_v9 = vpop.permute.xlu0 %28 }
  0x99   :  { %vm30_vm1 = vcmp.eq.s32.totalorder %v26_v8, %v29_v9 }
  0x9a   :  { %v31_v12 = vsel %vm30_vm1, %v17_v5, 0.0 }
  0x9b   :  { %v32_v13 = vsel %vm13_vm0, %v31_v12, 0.0 }
  0x9f   :  { %v52_v10 = vpop.eup %51 }
  0xa0   :  { %v20_v11 = vsel %vm13_vm0, %v52_v10, 0.0 }
  0xa1   :  { %21 = vadd.xlane.f32.xlu1 %v20_v11 }
  0xa5   :  { %33 = vadd.xlane.f32.xlu1 %v32_v13 }
 0x12e   :  { %v22_v14 = vpop.xlane.xlu1 %21 }
 0x12f   :  { %53 = vlog2.f32 %v22_v14 }
 0x132   :  { %v34_v17 = vpop.xlane.xlu1 %33 }
 0x139   :  { %v54_v15 = vpop.eup %53 }
 0x13a   :  { %v24_v16 = vmul.f32 0.6931472, %v54_v15 }
 0x13c   :  { %v35_v18 = vsub.f32 %v24_v16, %v34_v17 }
 0x13e   :  { %44 = vst.msk [vmem:[%s85_s2] sm:$0xff] %vm43_vm2, %v35_v18 }

</bundles_post_ra>
